<compile_context>
chip_gen: v5e
topology: v5e:2x2
jax: 0.10.0
libtpu: 0.0.40
codegen_flags: <defaults>
</compile_context>

<pallas_src>
import math

import jax
import jax.numpy as jnp
from jax.experimental import pallas as pl
from jax.experimental.pallas import tpu as pltpu


def _round_up(x, m):
    return (x + m - 1) // m * m


# ----------------------------------------------------------------------------
# Pallas kernel: fused chain of (x @ W_i + b_i) -> ReLU over one batch tile
# ----------------------------------------------------------------------------
def _make_ff_kernel(dims, compute_dtype):
    n_layers = len(dims) - 1

    def kernel(*refs):
        x_ref = refs[0]
        w_refs = refs[1:1 + n_layers]
        b_ref = refs[1 + n_layers]           # (n_layers, max_out) f32, zero padded
        o_ref = refs[2 + n_layers]

        h = x_ref[...].astype(compute_dtype)     # matmul input dtype (bf16)
        for i in range(n_layers):
            d_out = dims[i + 1]
            # MXU matmul with f32 accumulation.
            y = jnp.dot(h, w_refs[i][...], preferred_element_type=jnp.float32)
            # Bias add + ReLU on the f32 accumulator.  Each layer's bias is a
            # distinct row, so this single static-slice + broadcast per layer
            # is not a repeated-broadcast-in-loop problem.
            y = y + b_ref[i:i + 1, :d_out]
            h = jnp.maximum(y, 0.0)               # ReLU after every layer (spec)
            if i + 1 < n_layers:
                # Carry inter-layer activation in bf16 (identical numerics to
                # casting right before the next dot, half the live bytes).
                h = h.astype(compute_dtype)
        o_ref[...] = h.astype(o_ref.dtype)        # last layer written from f32

    return kernel


# ----------------------------------------------------------------------------
# Wrapper: batch-tiled pallas_call with resident weights
# ----------------------------------------------------------------------------
def simple_ff_pallas(x, weights, bias_packed, dims, *,
                     compute_dtype=jnp.bfloat16, block_m=256):
    """Fused forward for Simple_FF.

    x           : (B, dims[0])  (f32 here; pass bf16 + bf16 out if the
                   surrounding graph already produces/consumes bf16)
    weights     : list of (dims[i], dims[i+1]) bf16 arrays (transposed relative
                   to PyTorch's (out, in) layout, so the kernel does x @ W + b)
    bias_packed : (n_layers, max(dims[1:])) f32, row i = bias of layer i,
                   zero padded on the right.
    """
    B, d_in = x.shape
    assert d_in == dims[0]
    out_dim = dims[-1]
    n_layers = len(dims) - 1

    # --- batch tiling --------------------------------------------------------
    # Full-height MXU tiles when the batch allows it; always a multiple of 8.
    tm = min(block_m, _round_up(B, 8))
    n_tiles = pl.cdiv(B, tm)
    b_pad = n_tiles * tm
    if b_pad != B:
        x = jnp.pad(x, ((0, b_pad - B), (0, 0)))

    in_specs = (
        [pl.BlockSpec((tm, d_in), lambda i: (i, 0))]                       # x tile
        + [pl.BlockSpec(w.shape, lambda i: (0, 0)) for w in weights]       # resident
        + [pl.BlockSpec(bias_packed.shape, lambda i: (0, 0))]              # resident
    )
    out_specs = pl.BlockSpec((tm, out_dim), lambda i: (i, 0))

    # --- VMEM budget (generation-aware, always set, capped below physical) ---
    weight_bytes = sum(int(w.size) * w.dtype.itemsize for w in weights)
    bias_bytes = int(bias_packed.size) * bias_packed.dtype.itemsize
    io_tile_bytes = tm * (d_in + out_dim) * x.dtype.itemsize
    max_width = max(dims)
    act_bytes = tm * max_width * (4 + jnp.dtype(compute_dtype).itemsize)   # f32 acc + bf16 carry
    estimate = (2 * io_tile_bytes            # double-buffered x/out tiles
                + 2 * (weight_bytes + bias_bytes)  # resident (conservatively x2)
                + 2 * act_bytes)
    try:
        phys_vmem = pltpu.get_tpu_info().vmem_capacity_bytes
    except Exception:
        phys_vmem = 64 * 1024 * 1024         # assume the smallest (v7x per-TC) VMEM
    vmem_cap = int(phys_vmem * 0.85)
    vmem_limit = min(vmem_cap, max(int(estimate * 1.25), 32 * 1024 * 1024))
    # TODO(synk): if estimate > vmem_cap (huge weight stacks), stream weight
    #             tiles with pltpu.emit_pipeline instead of keeping them resident.

    # --- cost hint for the XLA scheduler --------------------------------------
    flops = 2 * b_pad * sum(dims[i] * dims[i + 1] for i in range(n_layers))
    bytes_accessed = (b_pad * d_in * x.dtype.itemsize
                      + weight_bytes + bias_bytes
                      + b_pad * out_dim * x.dtype.itemsize)
    cost = pl.CostEstimate(flops=flops, transcendentals=0,
                           bytes_accessed=bytes_accessed)

    out = pl.pallas_call(
        _make_ff_kernel(dims, compute_dtype),
        grid=(n_tiles,),
        out_shape=jax.ShapeDtypeStruct((b_pad, out_dim), x.dtype),
        in_specs=in_specs,
        out_specs=out_specs,
        compiler_params=pltpu.CompilerParams(
            dimension_semantics=("parallel",),   # megacore sharding on v7x
            vmem_limit_bytes=vmem_limit),
        cost_estimate=cost,
    )(x, *weights, bias_packed)

    return out[:B] if b_pad != B else out


# ----------------------------------------------------------------------------
# Parameter init (PyTorch nn.Linear-style uniform), weights transposed, bf16
# ----------------------------------------------------------------------------
def init_params(key, dims, weight_dtype=jnp.bfloat16):
    n_layers = len(dims) - 1
    keys = jax.random.split(key, 2 * n_layers)
    weights, biases = [], []
    for i in range(n_layers):
        fan_in, fan_out = dims[i], dims[i + 1]
        bound = 1.0 / math.sqrt(fan_in)
        w = jax.random.uniform(keys[2 * i], (fan_in, fan_out),
                               jnp.float32, -bound, bound)
        b = jax.random.uniform(keys[2 * i + 1], (fan_out,),
                               jnp.float32, -bound, bound)
        weights.append(w.astype(weight_dtype))
        biases.append(b)

    max_out = max(dims[1:])
    bias_packed = jnp.zeros((n_layers, max_out), jnp.float32)
    for i, b in enumerate(biases):
        bias_packed = bias_packed.at[i, :b.shape[0]].set(b)
    return weights, bias_packed


# ----------------------------------------------------------------------------
# Plain-JAX reference (identical dtype path to the kernel)
# ----------------------------------------------------------------------------
def simple_ff_reference(x, weights, bias_packed, dims, compute_dtype=jnp.bfloat16):
    n_layers = len(weights)
    h = x.astype(compute_dtype)
    for i, w in enumerate(weights):
        d_out = dims[i + 1]
        y = jnp.dot(h, w, preferred_element_type=jnp.float32)
        y = y + bias_packed[i, :d_out][None, :]
        h = jnp.maximum(y, 0.0)
        if i + 1 < n_layers:
            h = h.astype(compute_dtype)
    return h.astype(x.dtype)


if __name__ == "__main__":
    hidden_size = [256, 512, 128]   # every width a multiple of 128 (lane-dense)
    batch = 64                      # small demo batch, multiple of 8

    key = jax.random.PRNGKey(0)
    k_params, k_x = jax.random.split(key)

    weights, bias_packed = init_params(k_params, hidden_size)
    x = jax.random.normal(k_x, (batch, hidden_size[0]), jnp.float32)

    out = simple_ff_pallas(x, weights, bias_packed, hidden_size)
    out = jax.block_until_ready(out)

    ref = simple_ff_reference(x, weights, bias_packed, hidden_size)
    assert out.shape == (batch, hidden_size[-1]), out.shape
    assert jnp.allclose(out, ref, atol=2e-2, rtol=2e-2), \
        float(jnp.max(jnp.abs(out - ref)))

    print("KERNEL_OK")
</pallas_src>

<mosaic_0001>
module attributes {stable_mosaic.version = 11 : i64} {
  func.func @kernel(%arg0: i32, %arg1: memref<64x256xf32, #tpu.memory_space<vmem>>, %arg2: memref<256x512xbf16, #tpu.memory_space<vmem>>, %arg3: memref<512x128xbf16, #tpu.memory_space<vmem>>, %arg4: memref<2x512xf32, #tpu.memory_space<vmem>>, %arg5: memref<64x128xf32, #tpu.memory_space<vmem>>) attributes {dimension_semantics = [#tpu.dimension_semantics<parallel>], iteration_bounds = array<i64: 1>, scalar_prefetch = 0 : i64, scratch_operands = 0 : i64, tpu.core_type = #tpu.core_type<tc>, window_params = [{transform_indices = @transform_0, window_bounds = array<i64: 64, 256>}, {pipeline_mode = #tpu.pipeline_mode<synchronous>, transform_indices = @transform_1, window_bounds = array<i64: 256, 512>}, {pipeline_mode = #tpu.pipeline_mode<synchronous>, transform_indices = @transform_2, window_bounds = array<i64: 512, 128>}, {pipeline_mode = #tpu.pipeline_mode<synchronous>, transform_indices = @transform_3, window_bounds = array<i64: 2, 512>}, {transform_indices = @transform_4, window_bounds = array<i64: 64, 128>}]} {
    %c0 = arith.constant 0 : index
    %c0_0 = arith.constant 0 : index
    %0 = vector.load %arg1[%c0, %c0_0] : memref<64x256xf32, #tpu.memory_space<vmem>>, vector<64x256xf32>
    %1 = arith.truncf %0 : vector<64x256xf32> to vector<64x256xbf16>
    %c0_1 = arith.constant 0 : index
    %c0_2 = arith.constant 0 : index
    %2 = vector.load %arg2[%c0_1, %c0_2] : memref<256x512xbf16, #tpu.memory_space<vmem>>, vector<256x512xbf16>
    %cst = arith.constant dense<0.000000e+00> : vector<64x512xf32>
    %3 = tpu.matmul %1, %2, %cst {dimension_numbers = #tpu.dot_dimension_numbers<[1], [0], [0], [1], [0, 0, 1, 1], [], []>} : vector<64x256xbf16>, vector<256x512xbf16>, vector<64x512xf32> -> vector<64x512xf32>
    %c0_3 = arith.constant 0 : index
    %c0_4 = arith.constant 0 : index
    %4 = vector.load %arg4[%c0_3, %c0_4] : memref<2x512xf32, #tpu.memory_space<vmem>>, vector<1x512xf32>
    %5 = vector.broadcast %4 : vector<1x512xf32> to vector<64x512xf32>
    %6 = arith.addf %3, %5 : vector<64x512xf32>
    %cst_5 = arith.constant 0.000000e+00 : f32
    %7 = vector.broadcast %cst_5 : f32 to vector<64x512xf32>
    %8 = arith.maximumf %6, %7 : vector<64x512xf32>
    %9 = arith.truncf %8 : vector<64x512xf32> to vector<64x512xbf16>
    %c0_6 = arith.constant 0 : index
    %c0_7 = arith.constant 0 : index
    %10 = vector.load %arg3[%c0_6, %c0_7] : memref<512x128xbf16, #tpu.memory_space<vmem>>, vector<512x128xbf16>
    %cst_8 = arith.constant dense<0.000000e+00> : vector<64x128xf32>
    %11 = tpu.matmul %9, %10, %cst_8 {dimension_numbers = #tpu.dot_dimension_numbers<[1], [0], [0], [1], [0, 0, 1, 1], [], []>} : vector<64x512xbf16>, vector<512x128xbf16>, vector<64x128xf32> -> vector<64x128xf32>
    %c1 = arith.constant 1 : index
    %c0_9 = arith.constant 0 : index
    %12 = vector.load %arg4[%c1, %c0_9] : memref<2x512xf32, #tpu.memory_space<vmem>>, vector<1x128xf32>
    %13 = vector.broadcast %12 : vector<1x128xf32> to vector<64x128xf32>
    %14 = arith.addf %11, %13 : vector<64x128xf32>
    %cst_10 = arith.constant 0.000000e+00 : f32
    %15 = vector.broadcast %cst_10 : f32 to vector<64x128xf32>
    %16 = arith.maximumf %14, %15 : vector<64x128xf32>
    %c0_11 = arith.constant 0 : index
    %c0_12 = arith.constant 0 : index
    %17 = vector.load %arg5[%c0_11, %c0_12] : memref<64x128xf32, #tpu.memory_space<vmem>>, vector<64x128xf32>
    tpu.vector_store %arg5[%c0_11, %c0_12], %16 {strides = array<i32>} : memref<64x128xf32, #tpu.memory_space<vmem>>, vector<64x128xf32>,
    return
  }
  func.func @transform_0(%arg0: i32) -> (i32, i32) {
    %c0_i32 = arith.constant 0 : i32
    %c0_i32_0 = arith.constant 0 : i32
    return %arg0, %c0_i32 : i32, i32
  }
  func.func @transform_1(%arg0: i32) -> (i32, i32) {
    %c0_i32 = arith.constant 0 : i32
    %c0_i32_0 = arith.constant 0 : i32
    %c0_i32_1 = arith.constant 0 : i32
    return %c0_i32, %c0_i32_0 : i32, i32
  }
  func.func @transform_2(%arg0: i32) -> (i32, i32) {
    %c0_i32 = arith.constant 0 : i32
    %c0_i32_0 = arith.constant 0 : i32
    %c0_i32_1 = arith.constant 0 : i32
    return %c0_i32, %c0_i32_0 : i32, i32
  }
  func.func @transform_3(%arg0: i32) -> (i32, i32) {
    %c0_i32 = arith.constant 0 : i32
    %c0_i32_0 = arith.constant 0 : i32
    %c0_i32_1 = arith.constant 0 : i32
    return %c0_i32, %c0_i32_0 : i32, i32
  }
  func.func @transform_4(%arg0: i32) -> (i32, i32) {
    %c0_i32 = arith.constant 0 : i32
    %c0_i32_0 = arith.constant 0 : i32
    return %arg0, %c0_i32 : i32, i32
  }
}

</mosaic_0001>

<bundles_post_ra>
// kernel: tpu_custom_call.1
= control target key start
LH: loop header
LB: loop body
LE: loop exit
PB: predicated region body
PF: predicated region fallthrough
CT: control target
= control target key end

     0   :  { %9 = vsyncpa [#allocation3], 0  ;;  %s1939_s0 = inlined_call_operand.hbm [shape: f32[64,256], index: 0, kind: input, shape index: {}]   ;;  %s1940_s1 = inlined_call_operand.hbm [shape: bf16[256,512], index: 1, kind: input, shape index: {}]   ;;  %s1941_s2 = inlined_call_operand.hbm [shape: bf16[512,128], index: 2, kind: input, shape index: {}]   ;;  %s1942_s3 = inlined_call_operand.hbm [shape: f32[2,512], index: 3, kind: input, shape index: {}]   ;;  %s1943_s4 = inlined_call_operand.hbm [shape: f32[64,128], index: 4, kind: output, shape index: {}]  }
   0x1   :  { %10 = vsyncpa [#allocation6], 0 }
   0x2   :  { %11 = vsyncpa [#allocation9], 0 }
   0x3   :  { %12 = vsyncpa [#allocation4], 0  ;;  %s30_s17 = sshll.u32 %s1940_s1, 4  ;;  %s1808_s18 = smov [#allocation5]   ;;  %s31_s17 = int_to_ptr.hbm [resolvable:$true] %s30_s17 }
   0x4   :  { %s32_s19 = sshll.u32 %s1808_s18, 4  ;;  %s17_s22 = sshll.u32 %s1939_s0, 4  ;;  %s33_s19 = int_to_ptr.vmem [resolvable:$true] %s32_s19  ;;  %s18_s22 = int_to_ptr.hbm [resolvable:$true] %s17_s22 }
   0x5   :  { %s1809_s23 = smov 256   ;;  %s1810_s24 = smov 16  }
   0x6   :  { %38 = dma.hbm_to_vmem [thread:$0]  %s31_s17, 8192, %s33_s19, [#allocation6], %s1809_s23, %s1809_s23, %s1810_s24  }
   0x7   :  { %s1811_s25 = smov [#allocation2]   ;;  %s43_s29 = sshll.u32 %s1941_s2, 4  ;;  %s44_s29 = int_to_ptr.hbm [resolvable:$true] %s43_s29 }
   0x8   :  { %s19_s26 = sshll.u32 %s1811_s25, 4  ;;  %s1812_s1 = smov [#allocation7]   ;;  %s20_s26 = int_to_ptr.vmem [resolvable:$true] %s19_s26 }
   0x9   :  { %25 = dma.hbm_to_vmem [thread:$0]  %s18_s22, 2048, %s20_s26, [#allocation3], %s1809_s23, %s1809_s23, %s1810_s24  }
   0xa   :  { %s45_s30 = sshll.u32 %s1812_s1, 4  ;;  %s57_s0 = sshll.u32 %s1942_s3, 4  ;;  %s46_s30 = int_to_ptr.vmem [resolvable:$true] %s45_s30  ;;  %s58_s0 = int_to_ptr.hbm [resolvable:$true] %s57_s0 }
   0xb   :  { %s1813_s7 = smov 64   ;;  %s1814_s8 = smov 4  }
   0xc   :  { %51 = dma.hbm_to_vmem [thread:$0]  %s44_s29, 4096, %s46_s30, [#allocation6], %s1813_s7, %s1813_s7, %s1814_s8  }
   0xd   :  { %s1815_s9 = smov [#allocation8]  }
   0xe   :  { %s59_s10 = sshll.u32 %s1815_s9, 4  ;;  %s60_s10 = int_to_ptr.vmem [resolvable:$true] %s59_s10 }
   0xf   :  { %62 = dma.hbm_to_vmem [thread:$0]  %s58_s0, 128, %s60_s10, [#allocation9]  }
  0x10   :  { %1800 = dma.done.wait [#allocation3], 2048  }
  0x11   :  { %1801 = vsyncadd [#allocation3], 4294965248 }
  0x12   :  { %1802 = dma.done.wait [#allocation6], 12288  }
  0x13   :  { %1803 = vsyncadd [#allocation6], 4294955008 }
  0x14   :  { %1804 = dma.done.wait [#allocation9], 128  }
  0x15   :  { %1805 = vsyncadd [#allocation9], 4294967168  ;;  %v1302_v0 = vld [vmem:[#allocation5 + $0xe0] sm:$0xf]  ;;  %v1602_v1 = vld [vmem:[#allocation5 + $0xec] sm:$0xf0] }
  0x16   :  { %v1430_v2 = vld [vmem:[#allocation5 + $0x1e0] sm:$0xf]  ;;  %v1303_v3 = vor.u32 %v1602_v1, %v1302_v0  ;;  %v1634_v4 = vld [vmem:[#allocation5 + $0x1ec] sm:$0xf0]  ;;  %v1600_v5 = vld [vmem:[#allocation5 + $0xe4] sm:$0xf] }
  0x17   :  { %v1304_v6 = vld [vmem:[#allocation5 + $0xf0] sm:$0xf0]  ;;  %v1431_v7 = vor.u32 %v1634_v4, %v1430_v2  ;;  %v1632_v9 = vld [vmem:[#allocation5 + $0x1e4] sm:$0xf]  ;;  %v1286_v11 = vld [vmem:[#allocation5 + $0xc0] sm:$0xf] }
  0x18   :  { %v1307_v8 = vor.u32 %v1600_v5, %v1304_v6  ;;  %v1432_v10 = vld [vmem:[#allocation5 + $0x1f0] sm:$0xf0]  ;;  %497 = vmatpush.bf16.msra.mxu0 %v1303_v3  ;;  %v1598_v13 = vld [vmem:[#allocation5 + $0xcc] sm:$0xf0]  ;;  %v1414_v14 = vld [vmem:[#allocation5 + $0x1c0] sm:$0xf] }
  0x19   :  { %v1435_v12 = vor.u32 %v1632_v9, %v1432_v10  ;;  %v1630_v15 = vld [vmem:[#allocation5 + $0x1cc] sm:$0xf0]  ;;  %526 = vmatpush.bf16.msra.mxu1 %v1431_v7  ;;  %v1287_v16 = vor.u32 %v1598_v13, %v1286_v11  ;;  %v1596_v18 = vld [vmem:[#allocation5 + $0xc4] sm:$0xf]  ;;  %v1288_v19 = vld [vmem:[#allocation5 + $0xd0] sm:$0xf0] }
  0x1a   :  { %555 = vmatpush.bf16.msra.mxu2 %v1307_v8  ;;  %v1415_v17 = vor.u32 %v1630_v15, %v1414_v14  ;;  %v1628_v20 = vld [vmem:[#allocation5 + $0x1c4] sm:$0xf]  ;;  %v1291_v21 = vor.u32 %v1596_v18, %v1288_v19  ;;  %v1416_v22 = vld [vmem:[#allocation5 + $0x1d0] sm:$0xf0]  ;;  %v1270_v23 = vld [vmem:[#allocation5 + $0xa0] sm:$0xf] }
  0x1b   :  { %584 = vmatpush.bf16.msra.mxu3 %v1435_v12  ;;  %v1594_v24 = vld [vmem:[#allocation5 + $0xac] sm:$0xf0]  ;;  %v1419_v25 = vor.u32 %v1628_v20, %v1416_v22  ;;  %v1398_v26 = vld [vmem:[#allocation5 + $0x1a0] sm:$0xf]  ;;  %v1592_v28 = vld [vmem:[#allocation5 + $0xa4] sm:$0xf] }
  0x1c   :  { %v1626_v27 = vld [vmem:[#allocation5 + $0x1ac] sm:$0xf0]  ;;  %498 = vmatpush.bf16.msra.mxu0 %v1287_v16  ;;  %v1271_v29 = vor.u32 %v1594_v24, %v1270_v23  ;;  %v1272_v30 = vld [vmem:[#allocation5 + $0xb0] sm:$0xf0]  ;;  %v1624_v31 = vld [vmem:[#allocation5 + $0x1a4] sm:$0xf] }
  0x1d   :  { %v1400_v32 = vld [vmem:[#allocation5 + $0x1b0] sm:$0xf0]  ;;  %527 = vmatpush.bf16.msra.mxu1 %v1415_v17  ;;  %v1399_v33 = vor.u32 %v1626_v27, %v1398_v26  ;;  %v1275_v34 = vor.u32 %v1592_v28, %v1272_v30  ;;  %v1254_v35 = vld [vmem:[#allocation5 + $0x80] sm:$0xf]  ;;  %v1590_v36 = vld [vmem:[#allocation5 + $0x8c] sm:$0xf0] }
  0x1e   :  { %556 = vmatpush.bf16.msra.mxu2 %v1291_v21  ;;  %v1382_v37 = vld [vmem:[#allocation5 + $0x180] sm:$0xf]  ;;  %v1403_v38 = vor.u32 %v1624_v31, %v1400_v32  ;;  %v1622_v39 = vld [vmem:[#allocation5 + $0x18c] sm:$0xf0]  ;;  %v1588_v40 = vld [vmem:[#allocation5 + $0x84] sm:$0xf]  ;;  %v1255_v44 = vor.u32 %v1590_v36, %v1254_v35 }
  0x1f   :  { %585 = vmatpush.bf16.msra.mxu3 %v1419_v25  ;;  %v1256_v41 = vld [vmem:[#allocation5 + $0x90] sm:$0xf0]  ;;  %v1620_v42 = vld [vmem:[#allocation5 + $0x184] sm:$0xf]  ;;  %v1383_v45 = vor.u32 %v1622_v39, %v1382_v37  ;;  %v1238_v47 = vld [vmem:[#allocation5 + $0x60] sm:$0xf] }
  0x20   :  { %v1384_v43 = vld [vmem:[#allocation5 + $0x190] sm:$0xf0]  ;;  %499 = vmatpush.bf16.msra.mxu0 %v1271_v29  ;;  %v1259_v46 = vor.u32 %v1588_v40, %v1256_v41  ;;  %v1586_v48 = vld [vmem:[#allocation5 + $0x6c] sm:$0xf0]  ;;  %v1366_v49 = vld [vmem:[#allocation5 + $0x160] sm:$0xf] }
  0x21   :  { %528 = vmatpush.bf16.msra.mxu1 %v1399_v33  ;;  %v1387_v50 = vor.u32 %v1620_v42, %v1384_v43  ;;  %v1618_v51 = vld [vmem:[#allocation5 + $0x16c] sm:$0xf0]  ;;  %v1584_v52 = vld [vmem:[#allocation5 + $0x64] sm:$0xf]  ;;  %v1240_v53 = vld [vmem:[#allocation5 + $0x70] sm:$0xf0]  ;;  %v1239_v56 = vor.u32 %v1586_v48, %v1238_v47 }
  0x22   :  { %557 = vmatpush.bf16.msra.mxu2 %v1275_v34  ;;  %v1616_v54 = vld [vmem:[#allocation5 + $0x164] sm:$0xf]  ;;  %v1368_v55 = vld [vmem:[#allocation5 + $0x170] sm:$0xf0]  ;;  %v1367_v57 = vor.u32 %v1618_v51, %v1366_v49  ;;  %v1243_v58 = vor.u32 %v1584_v52, %v1240_v53  ;;  %v1222_v59 = vld [vmem:[#allocation5 + $0x40] sm:$0xf] }
  0x23   :  { %586 = vmatpush.bf16.msra.mxu3 %v1403_v38  ;;  %v1582_v60 = vld [vmem:[#allocation5 + $0x4c] sm:$0xf0]  ;;  %v1350_v61 = vld [vmem:[#allocation5 + $0x140] sm:$0xf]  ;;  %v1371_v62 = vor.u32 %v1616_v54, %v1368_v55  ;;  %v1580_v0 = vld [vmem:[#allocation5 + $0x44] sm:$0xf] }
  0x24   :  { %500 = vmatpush.bf16.msra.mxu0 %v1255_v44  ;;  %v1614_v63 = vld [vmem:[#allocation5 + $0x14c] sm:$0xf0]  ;;  %v1224_v1 = vld [vmem:[#allocation5 + $0x50] sm:$0xf0]  ;;  %v1612_v2 = vld [vmem:[#allocation5 + $0x144] sm:$0xf]  ;;  %v1223_v4 = vor.u32 %v1582_v60, %v1222_v59 }
  0x25   :  { %529 = vmatpush.bf16.msra.mxu1 %v1383_v45  ;;  %v1352_v3 = vld [vmem:[#allocation5 + $0x150] sm:$0xf0]  ;;  %v1351_v5 = vor.u32 %v1614_v63, %v1350_v61  ;;  %v1227_v6 = vor.u32 %v1580_v0, %v1224_v1  ;;  %v1206_v7 = vld [vmem:[#allocation5 + $0x20] sm:$0xf]  ;;  %v1578_v8 = vld [vmem:[#allocation5 + $0x2c] sm:$0xf0] }
  0x26   :  { %558 = vmatpush.bf16.msra.mxu2 %v1259_v46  ;;  %v1334_v9 = vld [vmem:[#allocation5 + $0x120] sm:$0xf]  ;;  %v1355_v10 = vor.u32 %v1612_v2, %v1352_v3  ;;  %v1610_v11 = vld [vmem:[#allocation5 + $0x12c] sm:$0xf0]  ;;  %v1576_v12 = vld [vmem:[#allocation5 + $0x24] sm:$0xf]  ;;  %v1207_v16 = vor.u32 %v1578_v8, %v1206_v7 }
  0x27   :  { %587 = vmatpush.bf16.msra.mxu3 %v1387_v50  ;;  %v1208_v13 = vld [vmem:[#allocation5 + $0x30] sm:$0xf0]  ;;  %v1608_v14 = vld [vmem:[#allocation5 + $0x124] sm:$0xf]  ;;  %v1190_v17 = vld [vmem:[#allocation5] sm:$0xf]  ;;  %v1335_v19 = vor.u32 %v1610_v11, %v1334_v9 }
  0x28   :  { %501 = vmatpush.bf16.msra.mxu0 %v1239_v56  ;;  %v1336_v15 = vld [vmem:[#allocation5 + $0x130] sm:$0xf0]  ;;  %v1574_v18 = vld [vmem:[#allocation5 + $0xc] sm:$0xf0]  ;;  %v1211_v20 = vor.u32 %v1576_v12, %v1208_v13  ;;  %v1318_v21 = vld [vmem:[#allocation5 + $0x100] sm:$0xf] }
  0x29   :  { %530 = vmatpush.bf16.msra.mxu1 %v1367_v57  ;;  %v1606_v22 = vld [vmem:[#allocation5 + $0x10c] sm:$0xf0]  ;;  %v1572_v23 = vld [vmem:[#allocation5 + $0x4] sm:$0xf]  ;;  %v1339_v24 = vor.u32 %v1608_v14, %v1336_v15  ;;  %v1192_v25 = vld [vmem:[#allocation5 + $0x10] sm:$0xf0]  ;;  %v1191_v31 = vor.u32 %v1574_v18, %v1190_v17 }
  0x2a   :  { %559 = vmatpush.bf16.msra.mxu2 %v1243_v58  ;;  %v1604_v26 = vld [vmem:[#allocation5 + $0x104] sm:$0xf]  ;;  %v1320_v27 = vld [vmem:[#allocation5 + $0x110] sm:$0xf0]  ;;  %v1601_v29 = vld [vmem:[#allocation5 + $0xec] sm:$0xf]  ;;  %v1319_v35 = vor.u32 %v1606_v22, %v1318_v21  ;;  %v1195_v36 = vor.u32 %v1572_v23, %v1192_v25 }
  0x2b   :  { %588 = vmatpush.bf16.msra.mxu3 %v1371_v62  ;;  %v79_v28 = vld [vmem:[#allocation2] sm:$0xff]  ;;  %v1312_v30 = vld [vmem:[#allocation5 + $0xf8] sm:$0xf0]  ;;  %v81_v32 = vld [vmem:[#allocation2 + $0x10] sm:$0xff]  ;;  %v1323_v39 = vor.u32 %v1604_v26, %v1320_v27  ;;  %s1816_s2 = smov [#allocation10]   ;;  %s1173_s13 = sshll.u32 %s1943_s4, 4  ;;  %s1174_s13 = int_to_ptr.hbm [resolvable:$true] %s1173_s13 }
  0x2c   :  { %502 = vmatpush.bf16.msra.mxu0 %v1223_v4  ;;  %v1633_v33 = vld [vmem:[#allocation5 + $0x1ec] sm:$0xf]  ;;  %v1440_v34 = vld [vmem:[#allocation5 + $0x1f8] sm:$0xf0]  ;;  %v1315_v40 = vor.u32 %v1601_v29, %v1312_v30  ;;  %v1310_v41 = vld [vmem:[#allocation5 + $0xe8] sm:$0xf]  ;;  %v1856_v44 = vpack.c.bf16 %v81_v32, %v79_v28 }
  0x2d   :  { %531 = vmatpush.bf16.msra.mxu1 %v1351_v5  ;;  %v80_v37 = vld [vmem:[#allocation2 + $0x8] sm:$0xff]  ;;  %v82_v38 = vld [vmem:[#allocation2 + $0x18] sm:$0xff]  ;;  %v1443_v45 = vor.u32 %v1633_v33, %v1440_v34  ;;  %v83_v14 = vld [vmem:[#allocation2 + $0x20] sm:$0xff]  ;;  %s1171_s3 = sshll.u32 %s1816_s2, 4  ;;  %s1817_s14 = smov 128   ;;  %s1172_s3 = int_to_ptr.vmem [resolvable:$true] %s1171_s3 }
  0x2e   :  { %560 = vmatpush.bf16.msra.mxu2 %v1227_v6  ;;  %v1603_v42 = vld [vmem:[#allocation5 + $0xf4] sm:$0xf0]  ;;  %v1438_v43 = vld [vmem:[#allocation5 + $0x1e8] sm:$0xf]  ;;  %v1597_v47 = vld [vmem:[#allocation5 + $0xcc] sm:$0xf]  ;;  %v1858_v49 = vpack.c.bf16 %v82_v38, %v80_v37 }
  0x2f   :  { %589 = vmatpush.bf16.msra.mxu3 %v1355_v10  ;;  %v1635_v46 = vld [vmem:[#allocation5 + $0x1f4] sm:$0xf0]  ;;  %v1296_v48 = vld [vmem:[#allocation5 + $0xd8] sm:$0xf0]  ;;  %v1629_v50 = vld [vmem:[#allocation5 + $0x1cc] sm:$0xf]  ;;  %v1311_v52 = vor.u32 %v1603_v42, %v1310_v41 }
  0x30   :  { %503 = vmatpush.bf16.msra.mxu0 %v1207_v16  ;;  %v1424_v51 = vld [vmem:[#allocation5 + $0x1d8] sm:$0xf0]  ;;  %v1439_v53 = vor.u32 %v1635_v46, %v1438_v43  ;;  %v1299_v54 = vor.u32 %v1597_v47, %v1296_v48  ;;  %v1294_v55 = vld [vmem:[#allocation5 + $0xc8] sm:$0xf]  ;;  %v1599_v56 = vld [vmem:[#allocation5 + $0xd4] sm:$0xf0] }
  0x31   :  { %532 = vmatpush.bf16.msra.mxu1 %v1335_v19  ;;  %v1422_v57 = vld [vmem:[#allocation5 + $0x1c8] sm:$0xf]  ;;  %v1427_v58 = vor.u32 %v1629_v50, %v1424_v51  ;;  %v1631_v59 = vld [vmem:[#allocation5 + $0x1d4] sm:$0xf0]  ;;  %v1593_v60 = vld [vmem:[#allocation5 + $0xac] sm:$0xf]  ;;  %v1295_v0 = vor.u32 %v1599_v56, %v1294_v55 }
  0x32   :  { %561 = vmatpush.bf16.msra.mxu2 %v1211_v20  ;;  %v1280_v61 = vld [vmem:[#allocation5 + $0xb8] sm:$0xf0]  ;;  %v1625_v62 = vld [vmem:[#allocation5 + $0x1ac] sm:$0xf]  ;;  %v1423_v1 = vor.u32 %v1631_v59, %v1422_v57  ;;  %v1278_v3 = vld [vmem:[#allocation5 + $0xa8] sm:$0xf] }
  0x33   :  { %590 = vmatpush.bf16.msra.mxu3 %v1339_v24  ;;  %v1408_v63 = vld [vmem:[#allocation5 + $0x1b8] sm:$0xf0]  ;;  %v1283_v2 = vor.u32 %v1593_v60, %v1280_v61  ;;  %v1595_v4 = vld [vmem:[#allocation5 + $0xb4] sm:$0xf0]  ;;  %v1406_v5 = vld [vmem:[#allocation5 + $0x1a8] sm:$0xf] }
  0x34   :  { %504 = vmatpush.bf16.msra.mxu0 %v1191_v31  ;;  %v1411_v6 = vor.u32 %v1625_v62, %v1408_v63  ;;  %v1627_v7 = vld [vmem:[#allocation5 + $0x1b4] sm:$0xf0]  ;;  %v1589_v8 = vld [vmem:[#allocation5 + $0x8c] sm:$0xf]  ;;  %v1264_v9 = vld [vmem:[#allocation5 + $0x98] sm:$0xf0]  ;;  %v1279_v12 = vor.u32 %v1595_v4, %v1278_v3 }
  0x35   :  { %533 = vmatpush.bf16.msra.mxu1 %v1319_v35  ;;  %v1621_v10 = vld [vmem:[#allocation5 + $0x18c] sm:$0xf]  ;;  %v1392_v11 = vld [vmem:[#allocation5 + $0x198] sm:$0xf0]  ;;  %v1262_v13 = vld [vmem:[#allocation5 + $0x88] sm:$0xf]  ;;  %v1407_v15 = vor.u32 %v1627_v7, %v1406_v5  ;;  %v1267_v16 = vor.u32 %v1589_v8, %v1264_v9 }
  0x36   :  { %562 = vmatpush.bf16.msra.mxu2 %v1195_v36  ;;  %v1591_v17 = vld [vmem:[#allocation5 + $0x94] sm:$0xf0]  ;;  %v1390_v18 = vld [vmem:[#allocation5 + $0x188] sm:$0xf]  ;;  %v1395_v20 = vor.u32 %v1621_v10, %v1392_v11  ;;  %v1585_v21 = vld [vmem:[#allocation5 + $0x6c] sm:$0xf] }
  0x37   :  { %591 = vmatpush.bf16.msra.mxu3 %v1323_v39  ;;  %505 = vmatmul.bf16.vlgmr.msra.gmra.mxu0 %v1856_v44  ;;  %v1623_v19 = vld [vmem:[#allocation5 + $0x194] sm:$0xf0]  ;;  %v1248_v22 = vld [vmem:[#allocation5 + $0x78] sm:$0xf0]  ;;  %v85_v23 = vld [vmem:[#allocation2 + $0x30] sm:$0xff]  ;;  %v1263_v28 = vor.u32 %v1591_v17, %v1262_v13  ;;  %s1818_s15 = smov 8  }
  0x38   :  { %534 = vmatmul.bf16.vlgmr.msra.gmra.mxu1 %v1858_v49  ;;  %613 = vmatpush.bf16.msrb.mxu0 %v1311_v52  ;;  %v1617_v24 = vld [vmem:[#allocation5 + $0x16c] sm:$0xf]  ;;  %v1376_v25 = vld [vmem:[#allocation5 + $0x178] sm:$0xf0]  ;;  %v1391_v29 = vor.u32 %v1623_v19, %v1390_v18  ;;  %v1251_v30 = vor.u32 %v1585_v21, %v1248_v22  ;;  %v1246_v31 = vld [vmem:[#allocation5 + $0x68] sm:$0xf]  ;;  %v1864_v34 = vpack.c.bf16 %v85_v23, %v83_v14 }
  0x39   :  { %563 = vmatmul.bf16.vlgmr.msra.gmra.mxu2 %v1856_v44  ;;  %642 = vmatpush.bf16.msrb.mxu1 %v1439_v53  ;;  %v84_v26 = vld [vmem:[#allocation2 + $0x28] sm:$0xff]  ;;  %v86_v27 = vld [vmem:[#allocation2 + $0x38] sm:$0xff]  ;;  %v1379_v35 = vor.u32 %v1617_v24, %v1376_v25  ;;  %v89_v13 = vld [vmem:[#allocation2 + $0x50] sm:$0xff] }
  0x3a   :  { %671 = vmatpush.bf16.msrb.mxu2 %v1315_v40  ;;  %592 = vmatmul.bf16.vlgmr.msra.gmra.mxu3 %v1858_v49  ;;  %v1587_v32 = vld [vmem:[#allocation5 + $0x74] sm:$0xf0]  ;;  %v1374_v33 = vld [vmem:[#allocation5 + $0x168] sm:$0xf]  ;;  %v1581_v37 = vld [vmem:[#allocation5 + $0x4c] sm:$0xf]  ;;  %v1866_v39 = vpack.c.bf16 %v86_v27, %v84_v26 }
  0x3b   :  { %700 = vmatpush.bf16.msrb.mxu3 %v1443_v45  ;;  %v1619_v36 = vld [vmem:[#allocation5 + $0x174] sm:$0xf0]  ;;  %v1232_v38 = vld [vmem:[#allocation5 + $0x58] sm:$0xf0]  ;;  %v1613_v40 = vld [vmem:[#allocation5 + $0x14c] sm:$0xf]  ;;  %v1247_v42 = vor.u32 %v1587_v32, %v1246_v31 }
  0x3c   :  { %614 = vmatpush.bf16.msrb.mxu0 %v1295_v0  ;;  %v1360_v41 = vld [vmem:[#allocation5 + $0x158] sm:$0xf0]  ;;  %v1375_v43 = vor.u32 %v1619_v36, %v1374_v33  ;;  %v1235_v45 = vor.u32 %v1581_v37, %v1232_v38  ;;  %v1230_v46 = vld [vmem:[#allocation5 + $0x48] sm:$0xf]  ;;  %v1583_v47 = vld [vmem:[#allocation5 + $0x54] sm:$0xf0] }
  0x3d   :  { %643 = vmatpush.bf16.msrb.mxu1 %v1423_v1  ;;  %v1363_v48 = vor.u32 %v1613_v40, %v1360_v41  ;;  %v1358_v50 = vld [vmem:[#allocation5 + $0x148] sm:$0xf]  ;;  %v1615_v51 = vld [vmem:[#allocation5 + $0x154] sm:$0xf0]  ;;  %v1231_v52 = vor.u32 %v1583_v47, %v1230_v46  ;;  %v1577_v53 = vld [vmem:[#allocation5 + $0x2c] sm:$0xf] }
  0x3e   :  { %672 = vmatpush.bf16.msrb.mxu2 %v1299_v54  ;;  %v1216_v54 = vld [vmem:[#allocation5 + $0x38] sm:$0xf0]  ;;  %v1609_v55 = vld [vmem:[#allocation5 + $0x12c] sm:$0xf]  ;;  %v1359_v56 = vor.u32 %v1615_v51, %v1358_v50  ;;  %v1214_v59 = vld [vmem:[#allocation5 + $0x28] sm:$0xf] }
  0x3f   :  { %701 = vmatpush.bf16.msrb.mxu3 %v1427_v58  ;;  %v1219_v57 = vor.u32 %v1577_v53, %v1216_v54  ;;  %v1344_v58 = vld [vmem:[#allocation5 + $0x138] sm:$0xf0]  ;;  %v1579_v60 = vld [vmem:[#allocation5 + $0x34] sm:$0xf0]  ;;  %v1342_v62 = vld [vmem:[#allocation5 + $0x128] sm:$0xf] }
  0x40   :  { %615 = vmatpush.bf16.msrb.mxu0 %v1279_v12  ;;  %v1347_v61 = vor.u32 %v1609_v55, %v1344_v58  ;;  %v1611_v63 = vld [vmem:[#allocation5 + $0x134] sm:$0xf0]  ;;  %v1573_v0 = vld [vmem:[#allocation5 + $0xc] sm:$0xf]  ;;  %v1200_v1 = vld [vmem:[#allocation5 + $0x18] sm:$0xf0]  ;;  %v1215_v4 = vor.u32 %v1579_v60, %v1214_v59 }
  0x41   :  { %644 = vmatpush.bf16.msrb.mxu1 %v1407_v15  ;;  %v1328_v3 = vld [vmem:[#allocation5 + $0x118] sm:$0xf0]  ;;  %v1343_v5 = vor.u32 %v1611_v63, %v1342_v62  ;;  %v1198_v7 = vld [vmem:[#allocation5 + $0x8] sm:$0xf]  ;;  %v1575_v8 = vld [vmem:[#allocation5 + $0x14] sm:$0xf0] }
  0x42   :  { %673 = vmatpush.bf16.msrb.mxu2 %v1283_v2  ;;  %v1605_v2 = vld [vmem:[#allocation5 + $0x10c] sm:$0xf]  ;;  %v1326_v10 = vld [vmem:[#allocation5 + $0x108] sm:$0xf]  ;;  %v1607_v11 = vld [vmem:[#allocation5 + $0x114] sm:$0xf0] }
  0x43   :  { %702 = vmatpush.bf16.msrb.mxu3 %v1411_v6  ;;  %v1203_v6 = vor.u32 %v1573_v0, %v1200_v1  ;;  %v1331_v9 = vor.u32 %v1605_v2, %v1328_v3  ;;  %v87_v12 = vld [vmem:[#allocation2 + $0x40] sm:$0xff]  ;;  %v88_v14 = vld [vmem:[#allocation2 + $0x48] sm:$0xff]  ;;  %v90_v15 = vld [vmem:[#allocation2 + $0x58] sm:$0xff]  ;;  %v1327_v17 = vor.u32 %v1607_v11, %v1326_v10 }
  0x44   :  { %616 = vmatpush.bf16.msrb.mxu0 %v1263_v28  ;;  %v99_v18 = vpack.c.bf16 %v89_v13, %v87_v12  ;;  %v100_v19 = vpack.c.bf16 %v90_v15, %v88_v14  ;;  %v93_v21 = vld [vmem:[#allocation2 + $0x70] sm:$0xff]  ;;  %v92_v22 = vld [vmem:[#allocation2 + $0x68] sm:$0xff]  ;;  %v94_v23 = vld [vmem:[#allocation2 + $0x78] sm:$0xff] }
  0x45   :  { %645 = vmatpush.bf16.msrb.mxu1 %v1391_v29  ;;  %v102_v25 = vpack.c.bf16 %v94_v23, %v92_v22  ;;  %v1643_v26 = vld [vmem:[#allocation7 + $0x38] sm:$0xff]  ;;  %v1642_v27 = vld [vmem:[#allocation7 + $0x30] sm:$0xff]  ;;  %v1641_v29 = vld [vmem:[#allocation7 + $0x28] sm:$0xff] }
  0x46   :  { %674 = vmatpush.bf16.msrb.mxu2 %v1267_v16  ;;  %v1199_v16 = vor.u32 %v1575_v8, %v1198_v7  ;;  %v1651_v28 = vld [vmem:[#allocation7 + $0x78] sm:$0xff]  ;;  %v1648_v32 = vld [vmem:[#allocation7 + $0x60] sm:$0xff]  ;;  %v1638_v33 = vld [vmem:[#allocation7 + $0x10] sm:$0xff] }
  0x47   :  { %703 = vmatpush.bf16.msrb.mxu3 %v1395_v20  ;;  %510 = vmatmul.bf16.gmra.mxu0 %v1864_v34  ;;  %v91_v20 = vld [vmem:[#allocation2 + $0x60] sm:$0xff]  ;;  %v1639_v31 = vld [vmem:[#allocation7 + $0x18] sm:$0xff]  ;;  %v1646_v36 = vld [vmem:[#allocation7 + $0x50] sm:$0xff] }
  0x48   :  { %539 = vmatmul.bf16.gmra.mxu1 %v1866_v39  ;;  %617 = vmatpush.bf16.msrb.mxu0 %v1247_v42  ;;  %v101_v24 = vpack.c.bf16 %v93_v21, %v91_v20  ;;  %v1636_v37 = vld [vmem:[#allocation7] sm:$0xff]  ;;  %v1645_v38 = vld [vmem:[#allocation7 + $0x48] sm:$0xff]  ;;  %v1659_v40 = vld [vmem:[#allocation7 + $0xb8] sm:$0xff] }
  0x49   :  { %568 = vmatmul.bf16.gmra.mxu2 %v1864_v34  ;;  %646 = vmatpush.bf16.msrb.mxu1 %v1375_v43  ;;  %v1667_v41 = vld [vmem:[#allocation7 + $0xf8] sm:$0xff]  ;;  %v1658_v42 = vld [vmem:[#allocation7 + $0xb0] sm:$0xff]  ;;  %v1880_v43 = vld [vmem:[#allocation8] ss:$2 sm:$0xf] }
  0x4a   :  { %675 = vmatpush.bf16.msrb.mxu2 %v1251_v30  ;;  %597 = vmatmul.bf16.gmra.mxu3 %v1866_v39  ;;  %v1650_v30 = vld [vmem:[#allocation7 + $0x70] sm:$0xff]  ;;  %v1883_v46 = vperm.slane %v1880_v43, 0  ;;  %v1657_v51 = vld [vmem:[#allocation7 + $0xa8] sm:$0xff]  ;;  %v1887_v53 = vperm.slane %v1880_v43, 1  ;;  %v1656_v0 = vld [vmem:[#allocation7 + $0xa0] sm:$0xff] }
  0x4b   :  { %704 = vmatpush.bf16.msrb.mxu3 %v1379_v35  ;;  %v1637_v35 = vld [vmem:[#allocation7 + $0x8] sm:$0xff]  ;;  %v1664_v11 = vld [vmem:[#allocation7 + $0xe0] sm:$0xff]  ;;  %v1655_v13 = vld [vmem:[#allocation7 + $0x98] sm:$0xff] }
  0x4c   :  { %618 = vmatpush.bf16.msrb.mxu0 %v1231_v52  ;;  %v1663_v23 = vld [vmem:[#allocation7 + $0xd8] sm:$0xff] }
  0x4d   :  { %647 = vmatpush.bf16.msrb.mxu1 %v1359_v56 }
  0x4e   :  { %676 = vmatpush.bf16.msrb.mxu2 %v1235_v45 }
  0x4f   :  { %705 = vmatpush.bf16.msrb.mxu3 %v1363_v48  ;;  %v1666_v48 = vld [vmem:[#allocation7 + $0xf0] sm:$0xff] }
  0x50   :  { %619 = vmatpush.bf16.msrb.mxu0 %v1215_v4 }
  0x51   :  { %648 = vmatpush.bf16.msrb.mxu1 %v1343_v5 }
  0x52   :  { %677 = vmatpush.bf16.msrb.mxu2 %v1219_v57 }
  0x53   :  { %706 = vmatpush.bf16.msrb.mxu3 %v1347_v61  ;;  %v1665_v61 = vld [vmem:[#allocation7 + $0xe8] sm:$0xff] }
  0x54   :  { %620 = vmatpush.bf16.msrb.mxu0 %v1199_v16 }
  0x55   :  { %649 = vmatpush.bf16.msrb.mxu1 %v1327_v17 }
  0x56   :  { %678 = vmatpush.bf16.msrb.mxu2 %v1203_v6 }
  0x57   :  { %707 = vmatpush.bf16.msrb.mxu3 %v1331_v9  ;;  %515 = vmatmul.bf16.gmra.mxu0 %v99_v18 }
  0x58   :  { %544 = vmatmul.bf16.gmra.mxu1 %v100_v19  ;;  %1035 = vmatpush.bf16.msra.mxu0 %v1643_v26  ;;  %v1654_v26 = vld [vmem:[#allocation7 + $0x90] sm:$0xff] }
  0x59   :  { %573 = vmatmul.bf16.gmra.mxu2 %v99_v18  ;;  %1064 = vmatpush.bf16.msra.mxu1 %v1651_v28 }
  0x5a   :  { %602 = vmatmul.bf16.gmra.mxu3 %v100_v19  ;;  %1093 = vmatpush.bf16.msra.mxu2 %v1659_v40 }
  0x5b   :  { %1122 = vmatpush.bf16.msra.mxu3 %v1667_v41 }
  0x5c   :  { %1036 = vmatpush.bf16.msra.mxu0 %v1642_v27 }
  0x5d   :  { %1065 = vmatpush.bf16.msra.mxu1 %v1650_v30 }
  0x5e   :  { %1094 = vmatpush.bf16.msra.mxu2 %v1658_v42 }
  0x5f   :  { %1123 = vmatpush.bf16.msra.mxu3 %v1666_v48 }
  0x60   :  { %1037 = vmatpush.bf16.msra.mxu0 %v1641_v29 }
  0x62   :  { %1095 = vmatpush.bf16.msra.mxu2 %v1657_v51  ;;  %v1661_v51 = vld [vmem:[#allocation7 + $0xc8] sm:$0xff] }
  0x63   :  { %1124 = vmatpush.bf16.msra.mxu3 %v1665_v61 }
  0x66   :  { %1096 = vmatpush.bf16.msra.mxu2 %v1656_v0 }
  0x67   :  { %520 = vmatmul.bf16.gmra.mxu0 %v101_v24  ;;  %1125 = vmatpush.bf16.msra.mxu3 %v1664_v11 }
  0x68   :  { %549 = vmatmul.bf16.gmra.mxu1 %v102_v25 }
  0x69   :  { %578 = vmatmul.bf16.gmra.mxu2 %v101_v24 }
  0x6a   :  { %607 = vmatmul.bf16.gmra.mxu3 %v102_v25  ;;  %1097 = vmatpush.bf16.msra.mxu2 %v1655_v13 }
  0x6b   :  { %1126 = vmatpush.bf16.msra.mxu3 %v1663_v23 }
  0x6e   :  { %1098 = vmatpush.bf16.msra.mxu2 %v1654_v26 }
  0x77   :  { %621 = vmatmul.bf16.vlgmr.msrb.gmra.mxu0 %v1856_v44 }
  0x78   :  { %650 = vmatmul.bf16.vlgmr.msrb.gmra.mxu1 %v1858_v49 }
  0x79   :  { %679 = vmatmul.bf16.vlgmr.msrb.gmra.mxu2 %v1856_v44  ;;  %v1640_v44 = vld [vmem:[#allocation7 + $0x20] sm:$0xff] }
  0x7a   :  { %708 = vmatmul.bf16.vlgmr.msrb.gmra.mxu3 %v1858_v49  ;;  %1038 = vmatpush.bf16.msra.mxu0 %v1640_v44  ;;  %v1649_v49 = vld [vmem:[#allocation7 + $0x68] sm:$0xff] }
  0x7b   :  { %1066 = vmatpush.bf16.msra.mxu1 %v1649_v49 }
  0x7e   :  { %1039 = vmatpush.bf16.msra.mxu0 %v1639_v31 }
  0x7f   :  { %1067 = vmatpush.bf16.msra.mxu1 %v1648_v32 }
  0x82   :  { %1040 = vmatpush.bf16.msra.mxu0 %v1638_v33 }
  0x86   :  { %1041 = vmatpush.bf16.msra.mxu0 %v1637_v35  ;;  %v1662_v35 = vld [vmem:[#allocation7 + $0xd0] sm:$0xff] }
  0x87   :  { %626 = vmatmul.bf16.gmra.mxu0 %v1864_v34  ;;  %1127 = vmatpush.bf16.msra.mxu3 %v1662_v35 }
  0x88   :  { %655 = vmatmul.bf16.gmra.mxu1 %v1866_v39 }
  0x89   :  { %684 = vmatmul.bf16.gmra.mxu2 %v1864_v34  ;;  %v1647_v34 = vld [vmem:[#allocation7 + $0x58] sm:$0xff] }
  0x8a   :  { %713 = vmatmul.bf16.gmra.mxu3 %v1866_v39  ;;  %1068 = vmatpush.bf16.msra.mxu1 %v1647_v34  ;;  %v1644_v39 = vld [vmem:[#allocation7 + $0x40] sm:$0xff] }
  0x8b   :  { %1042 = vmatpush.bf16.msra.mxu0 %v1636_v37  ;;  %v1653_v37 = vld [vmem:[#allocation7 + $0x88] sm:$0xff]  ;;  %1128 = vmatpush.bf16.msra.mxu3 %v1661_v51 }
  0x8c   :  { %1099 = vmatpush.bf16.msra.mxu2 %v1653_v37 }
  0x8e   :  { %1069 = vmatpush.bf16.msra.mxu1 %v1646_v36 }
  0x92   :  { %1070 = vmatpush.bf16.msra.mxu1 %v1645_v38 }
  0x96   :  { %1071 = vmatpush.bf16.msra.mxu1 %v1644_v39 }
  0x97   :  { %631 = vmatmul.bf16.gmra.mxu0 %v99_v18 }
  0x98   :  { %660 = vmatmul.bf16.gmra.mxu1 %v100_v19 }
  0x99   :  { %689 = vmatmul.bf16.gmra.mxu2 %v99_v18 }
  0x9a   :  { %718 = vmatmul.bf16.gmra.mxu3 %v100_v19 }
  0xa7   :  { %636 = vmatmul.bf16.gmra.mxu0 %v101_v24 }
  0xa8   :  { %665 = vmatmul.bf16.gmra.mxu1 %v102_v25 }
  0xa9   :  { %694 = vmatmul.bf16.gmra.mxu2 %v101_v24 }
  0xaa   :  { %723 = vmatmul.bf16.gmra.mxu3 %v102_v25 }
  0xb4   :  { %v506_v45 = vpop.f32.mrf.mxu0 }
  0xb5   :  { %v535_v47 = vpop.f32.mrf.mxu1  ;;  %v507_v50 = vadd.f32 %v506_v45, %v1883_v46 }
  0xb7   :  { %v536_v56 = vadd.f32 %v535_v47, %v507_v50 }
  0xb9   :  { %v729_v62 = vmax.f32 %v536_v56, 0.0 }
  0xbc   :  { %v564_v52 = vpop.f32.mrf.mxu2  ;;  %v508_v55 = vpop.f32.mrf.mxu0 }
  0xbd   :  { %v593_v54 = vpop.f32.mrf.mxu3  ;;  %v509_v57 = vadd.f32 %v508_v55, %v1883_v46  ;;  %v537_v58 = vpop.f32.mrf.mxu1  ;;  %v565_v60 = vadd.f32 %v564_v52, %v1887_v53  ;;  %v1652_v55 = vld [vmem:[#allocation7 + $0x80] sm:$0xff] }
  0xbe   :  { %1100 = vmatpush.bf16.msra.mxu2 %v1652_v55 }
  0xbf   :  { %v538_v59 = vadd.f32 %v537_v58, %v509_v57  ;;  %v594_v3 = vadd.f32 %v593_v54, %v565_v60 }
  0xc1   :  { %v733_v63 = vmax.f32 %v538_v59, 0.0  ;;  %v730_v9 = vmax.f32 %v594_v3, 0.0 }
  0xc3   :  { %v761_v1 = vpack.c.bf16 %v733_v63, %v729_v62 }
  0xc4   :  { %v566_v2 = vpop.f32.mrf.mxu2  ;;  %v511_v6 = vpop.f32.mrf.mxu0 }
  0xc5   :  { %v567_v4 = vadd.f32 %v566_v2, %v1887_v53  ;;  %v595_v5 = vpop.f32.mrf.mxu3  ;;  %v540_v7 = vpop.f32.mrf.mxu1  ;;  %1043 = vmatmul.bf16.vlgmr.msra.gmra.mxu0 %v761_v1  ;;  %v512_v12 = vadd.f32 %v511_v6, %v1883_v46  ;;  %v1660_v2 = vld [vmem:[#allocation7 + $0xc0] sm:$0xff] }
  0xc6   :  { %1129 = vmatpush.bf16.msra.mxu3 %v1660_v2 }
  0xc7   :  { %v596_v8 = vadd.f32 %v595_v5, %v567_v4  ;;  %v541_v18 = vadd.f32 %v540_v7, %v512_v12 }
  0xc9   :  { %v734_v10 = vmax.f32 %v596_v8, 0.0  ;;  %v737_v24 = vmax.f32 %v541_v18, 0.0 }
  0xcb   :  { %v762_v14 = vpack.c.bf16 %v734_v10, %v730_v9 }
  0xcc   :  { %v569_v15 = vpop.f32.mrf.mxu2  ;;  %v513_v17 = vpop.f32.mrf.mxu0 }
  0xcd   :  { %v598_v16 = vpop.f32.mrf.mxu3  ;;  %1072 = vmatmul.bf16.vlgmr.msra.gmra.mxu1 %v762_v14  ;;  %v514_v19 = vadd.f32 %v513_v17, %v1883_v46  ;;  %v542_v20 = vpop.f32.mrf.mxu1  ;;  %v570_v22 = vadd.f32 %v569_v15, %v1887_v53 }
  0xcf   :  { %v543_v21 = vadd.f32 %v542_v20, %v514_v19  ;;  %v599_v29 = vadd.f32 %v598_v16, %v570_v22 }
  0xd1   :  { %v741_v25 = vmax.f32 %v543_v21, 0.0  ;;  %v738_v33 = vmax.f32 %v599_v29, 0.0  ;;  %v1905_v21 = vperm.slane %v1880_v43, 2 }
  0xd3   :  { %v765_v28 = vpack.c.bf16 %v741_v25, %v737_v24 }
  0xd4   :  { %v571_v27 = vpop.f32.mrf.mxu2  ;;  %v516_v49 = vpop.f32.mrf.mxu0 }
  0xd5   :  { %v572_v30 = vadd.f32 %v571_v27, %v1887_v53  ;;  %v600_v44 = vpop.f32.mrf.mxu3  ;;  %v545_v31 = vpop.f32.mrf.mxu1  ;;  %1048 = vmatmul.bf16.gmra.mxu0 %v765_v28  ;;  %v517_v36 = vadd.f32 %v516_v49, %v1883_v46  ;;  %v1909_v28 = vperm.slane %v1880_v43, 3 }
  0xd7   :  { %v601_v32 = vadd.f32 %v600_v44, %v572_v30  ;;  %v546_v42 = vadd.f32 %v545_v31, %v517_v36 }
  0xd9   :  { %v742_v34 = vmax.f32 %v601_v32, 0.0  ;;  %v745_v52 = vmax.f32 %v546_v42, 0.0 }
  0xdb   :  { %v766_v38 = vpack.c.bf16 %v742_v34, %v738_v33 }
  0xdc   :  { %v574_v39 = vpop.f32.mrf.mxu2  ;;  %v518_v41 = vpop.f32.mrf.mxu0 }
  0xdd   :  { %v603_v40 = vpop.f32.mrf.mxu3  ;;  %1077 = vmatmul.bf16.gmra.mxu1 %v766_v38  ;;  %v519_v45 = vadd.f32 %v518_v41, %v1883_v46  ;;  %v547_v47 = vpop.f32.mrf.mxu1  ;;  %v575_v50 = vadd.f32 %v574_v39, %v1887_v53 }
  0xdf   :  { %v548_v48 = vadd.f32 %v547_v47, %v519_v45  ;;  %v604_v58 = vadd.f32 %v603_v40, %v575_v50 }
  0xe1   :  { %v749_v54 = vmax.f32 %v548_v48, 0.0  ;;  %v746_v0 = vmax.f32 %v604_v58, 0.0 }
  0xe3   :  { %v769_v57 = vpack.c.bf16 %v749_v54, %v745_v52 }
  0xe4   :  { %v576_v56 = vpop.f32.mrf.mxu2  ;;  %v521_v61 = vpop.f32.mrf.mxu0 }
  0xe5   :  { %v577_v59 = vadd.f32 %v576_v56, %v1887_v53  ;;  %v605_v60 = vpop.f32.mrf.mxu3  ;;  %v550_v62 = vpop.f32.mrf.mxu1  ;;  %1053 = vmatmul.bf16.gmra.mxu0 %v769_v57  ;;  %v522_v3 = vadd.f32 %v521_v61, %v1883_v46 }
  0xe7   :  { %v606_v63 = vadd.f32 %v605_v60, %v577_v59  ;;  %v551_v8 = vadd.f32 %v550_v62, %v522_v3 }
  0xe9   :  { %v750_v1 = vmax.f32 %v606_v63, 0.0  ;;  %v753_v13 = vmax.f32 %v551_v8, 0.0 }
  0xeb   :  { %v770_v4 = vpack.c.bf16 %v750_v1, %v746_v0 }
  0xec   :  { %v579_v5 = vpop.f32.mrf.mxu2  ;;  %v523_v7 = vpop.f32.mrf.mxu0 }
  0xed   :  { %v608_v6 = vpop.f32.mrf.mxu3  ;;  %1082 = vmatmul.bf16.gmra.mxu1 %v770_v4  ;;  %v524_v9 = vadd.f32 %v523_v7, %v1883_v46  ;;  %v552_v10 = vpop.f32.mrf.mxu1  ;;  %v580_v12 = vadd.f32 %v579_v5, %v1887_v53 }
  0xef   :  { %v553_v11 = vadd.f32 %v552_v10, %v524_v9  ;;  %v609_v17 = vadd.f32 %v608_v6, %v580_v12 }
  0xf1   :  { %v757_v14 = vmax.f32 %v553_v11, 0.0  ;;  %v754_v46 = vmax.f32 %v609_v17, 0.0 }
  0xf3   :  { %v773_v16 = vpack.c.bf16 %v757_v14, %v753_v13 }
  0xf4   :  { %v581_v15 = vpop.f32.mrf.mxu2  ;;  %v622_v20 = vpop.f32.mrf.mxu0 }
  0xf5   :  { %v582_v18 = vadd.f32 %v581_v15, %v1887_v53  ;;  %v610_v19 = vpop.f32.mrf.mxu3  ;;  %v651_v22 = vpop.f32.mrf.mxu1  ;;  %1058 = vmatmul.bf16.gmra.mxu0 %v773_v16  ;;  %v623_v25 = vadd.f32 %v622_v20, %v1905_v21 }
  0xf7   :  { %v611_v23 = vadd.f32 %v610_v19, %v582_v18  ;;  %v652_v30 = vadd.f32 %v651_v22, %v623_v25 }
  0xf9   :  { %v758_v24 = vmax.f32 %v611_v23, 0.0  ;;  %v731_v33 = vmax.f32 %v652_v30, 0.0 }
  0xfb   :  { %v774_v26 = vpack.c.bf16 %v758_v24, %v754_v46 }
  0xfc   :  { %v680_v27 = vpop.f32.mrf.mxu2  ;;  %v624_v53 = vpop.f32.mrf.mxu0 }
  0xfd   :  { %v709_v29 = vpop.f32.mrf.mxu3  ;;  %1087 = vmatmul.bf16.gmra.mxu1 %v774_v26  ;;  %v625_v44 = vadd.f32 %v624_v53, %v1905_v21  ;;  %v653_v49 = vpop.f32.mrf.mxu1  ;;  %v681_v32 = vadd.f32 %v680_v27, %v1909_v28 }
  0xff   :  { %v654_v31 = vadd.f32 %v653_v49, %v625_v44  ;;  %v710_v37 = vadd.f32 %v709_v29, %v681_v32 }
 0x101   :  { %v735_v34 = vmax.f32 %v654_v31, 0.0  ;;  %v732_v42 = vmax.f32 %v710_v37, 0.0 }
 0x103   :  { %v763_v35 = vpack.c.bf16 %v735_v34, %v731_v33 }
 0x104   :  { %v682_v36 = vpop.f32.mrf.mxu2  ;;  %v627_v43 = vpop.f32.mrf.mxu0 }
 0x105   :  { %v683_v38 = vadd.f32 %v682_v36, %v1909_v28  ;;  %v711_v39 = vpop.f32.mrf.mxu3  ;;  %v656_v40 = vpop.f32.mrf.mxu1  ;;  %1101 = vmatmul.bf16.vlgmr.msra.gmra.mxu2 %v763_v35  ;;  %v628_v47 = vadd.f32 %v627_v43, %v1905_v21 }
 0x107   :  { %v712_v41 = vadd.f32 %v711_v39, %v683_v38  ;;  %v657_v54 = vadd.f32 %v656_v40, %v628_v47 }
 0x109   :  { %v736_v45 = vmax.f32 %v712_v41, 0.0  ;;  %v739_v59 = vmax.f32 %v657_v54, 0.0 }
 0x10b   :  { %v764_v48 = vpack.c.bf16 %v736_v45, %v732_v42 }
 0x10c   :  { %v685_v50 = vpop.f32.mrf.mxu2  ;;  %v629_v52 = vpop.f32.mrf.mxu0 }
 0x10d   :  { %v714_v51 = vpop.f32.mrf.mxu3  ;;  %1130 = vmatmul.bf16.vlgmr.msra.gmra.mxu3 %v764_v48  ;;  %v630_v55 = vadd.f32 %v629_v52, %v1905_v21  ;;  %v658_v56 = vpop.f32.mrf.mxu1  ;;  %v686_v58 = vadd.f32 %v685_v50, %v1909_v28 }
 0x10f   :  { %v659_v57 = vadd.f32 %v658_v56, %v630_v55  ;;  %v715_v63 = vadd.f32 %v714_v51, %v686_v58  ;;  %v1926_v55 = vld [vmem:[#allocation8 + $0x1] ss:$0 sm:$0xff] }
 0x111   :  { %v743_v60 = vmax.f32 %v659_v57, 0.0  ;;  %v740_v5 = vmax.f32 %v715_v63, 0.0 }
 0x113   :  { %v767_v62 = vpack.c.bf16 %v743_v60, %v739_v59 }
 0x114   :  { %v687_v61 = vpop.f32.mrf.mxu2  ;;  %v632_v2 = vpop.f32.mrf.mxu0 }
 0x115   :  { %v688_v0 = vadd.f32 %v687_v61, %v1909_v28  ;;  %v716_v1 = vpop.f32.mrf.mxu3  ;;  %v661_v3 = vpop.f32.mrf.mxu1  ;;  %1106 = vmatmul.bf16.gmra.mxu2 %v767_v62  ;;  %v633_v7 = vadd.f32 %v632_v2, %v1905_v21 }
 0x117   :  { %v717_v4 = vadd.f32 %v716_v1, %v688_v0  ;;  %v662_v12 = vadd.f32 %v661_v3, %v633_v7 }
 0x119   :  { %v744_v6 = vmax.f32 %v717_v4, 0.0  ;;  %v747_v17 = vmax.f32 %v662_v12, 0.0 }
 0x11b   :  { %v768_v8 = vpack.c.bf16 %v744_v6, %v740_v5 }
 0x11c   :  { %v690_v9 = vpop.f32.mrf.mxu2  ;;  %v634_v11 = vpop.f32.mrf.mxu0 }
 0x11d   :  { %v719_v10 = vpop.f32.mrf.mxu3  ;;  %1135 = vmatmul.bf16.gmra.mxu3 %v768_v8  ;;  %v635_v13 = vadd.f32 %v634_v11, %v1905_v21  ;;  %v663_v14 = vpop.f32.mrf.mxu1  ;;  %v691_v16 = vadd.f32 %v690_v9, %v1909_v28 }
 0x11f   :  { %v664_v15 = vadd.f32 %v663_v14, %v635_v13  ;;  %v720_v22 = vadd.f32 %v719_v10, %v691_v16 }
 0x121   :  { %v751_v18 = vmax.f32 %v664_v15, 0.0  ;;  %v748_v27 = vmax.f32 %v720_v22, 0.0 }
 0x123   :  { %v771_v20 = vpack.c.bf16 %v751_v18, %v747_v17 }
 0x124   :  { %v692_v19 = vpop.f32.mrf.mxu2  ;;  %v637_v24 = vpop.f32.mrf.mxu0 }
 0x125   :  { %v693_v23 = vadd.f32 %v692_v19, %v1909_v28  ;;  %v721_v46 = vpop.f32.mrf.mxu3  ;;  %v666_v25 = vpop.f32.mrf.mxu1  ;;  %1111 = vmatmul.bf16.gmra.mxu2 %v771_v20  ;;  %v638_v53 = vadd.f32 %v637_v24, %v1905_v21 }
 0x127   :  { %v722_v26 = vadd.f32 %v721_v46, %v693_v23  ;;  %v667_v32 = vadd.f32 %v666_v25, %v638_v53 }
 0x129   :  { %v752_v29 = vmax.f32 %v722_v26, 0.0  ;;  %v755_v37 = vmax.f32 %v667_v32, 0.0 }
 0x12b   :  { %v772_v30 = vpack.c.bf16 %v752_v29, %v748_v27 }
 0x12c   :  { %v695_v44 = vpop.f32.mrf.mxu2  ;;  %v639_v31 = vpop.f32.mrf.mxu0 }
 0x12d   :  { %v724_v49 = vpop.f32.mrf.mxu3  ;;  %1140 = vmatmul.bf16.gmra.mxu3 %v772_v30  ;;  %v640_v33 = vadd.f32 %v639_v31, %v1905_v21  ;;  %v668_v34 = vpop.f32.mrf.mxu1  ;;  %v696_v36 = vadd.f32 %v695_v44, %v1909_v28 }
 0x12f   :  { %v669_v35 = vadd.f32 %v668_v34, %v640_v33  ;;  %v725_v40 = vadd.f32 %v724_v49, %v696_v36 }
 0x131   :  { %v759_v38 = vmax.f32 %v669_v35, 0.0  ;;  %v756_v47 = vmax.f32 %v725_v40, 0.0 }
 0x133   :  { %v775_v43 = vpack.c.bf16 %v759_v38, %v755_v37 }
 0x134   :  { %v697_v39 = vpop.f32.mrf.mxu2 }
 0x135   :  { %v698_v41 = vadd.f32 %v697_v39, %v1909_v28  ;;  %v726_v42 = vpop.f32.mrf.mxu3  ;;  %1116 = vmatmul.bf16.gmra.mxu2 %v775_v43 }
 0x137   :  { %v727_v45 = vadd.f32 %v726_v42, %v698_v41 }
 0x139   :  { %v760_v48 = vmax.f32 %v727_v45, 0.0 }
 0x13b   :  { %v776_v50 = vpack.c.bf16 %v760_v48, %v756_v47 }
 0x13d   :  { %1145 = vmatmul.bf16.gmra.mxu3 %v776_v50 }
 0x142   :  { %v1044_v51 = vpop.f32.mrf.mxu0 }
 0x143   :  { %v1045_v57 = vadd.f32 %v1926_v55, %v1044_v51 }
 0x14a   :  { %v1073_v21 = vpop.f32.mrf.mxu1  ;;  %v1046_v52 = vpop.f32.mrf.mxu0 }
 0x14b   :  { %v1074_v58 = vadd.f32 %v1073_v21, %v1045_v57  ;;  %v1047_v0 = vadd.f32 %v1926_v55, %v1046_v52 }
 0x152   :  { %v1075_v54 = vpop.f32.mrf.mxu1  ;;  %v1049_v59 = vpop.f32.mrf.mxu0 }
 0x153   :  { %v1076_v2 = vadd.f32 %v1075_v54, %v1047_v0  ;;  %v1050_v9 = vadd.f32 %v1926_v55, %v1049_v59 }
 0x15a   :  { %v1078_v28 = vpop.f32.mrf.mxu1  ;;  %v1051_v4 = vpop.f32.mrf.mxu0 }
 0x15b   :  { %v1079_v11 = vadd.f32 %v1078_v28, %v1050_v9  ;;  %v1052_v17 = vadd.f32 %v1926_v55, %v1051_v4 }
 0x162   :  { %v1080_v8 = vpop.f32.mrf.mxu1  ;;  %v1054_v16 = vpop.f32.mrf.mxu0 }
 0x163   :  { %v1081_v20 = vadd.f32 %v1080_v8, %v1052_v17  ;;  %v1055_v25 = vadd.f32 %v1926_v55, %v1054_v16 }
 0x16a   :  { %v1083_v19 = vpop.f32.mrf.mxu1  ;;  %v1056_v27 = vpop.f32.mrf.mxu0 }
 0x16b   :  { %v1084_v29 = vadd.f32 %v1083_v19, %v1055_v25  ;;  %v1057_v32 = vadd.f32 %v1926_v55, %v1056_v27 }
 0x172   :  { %v1085_v53 = vpop.f32.mrf.mxu1  ;;  %v1059_v35 = vpop.f32.mrf.mxu0 }
 0x173   :  { %v1086_v34 = vadd.f32 %v1085_v53, %v1057_v32  ;;  %v1060_v40 = vadd.f32 %v1926_v55, %v1059_v35 }
 0x17a   :  { %v1088_v37 = vpop.f32.mrf.mxu1  ;;  %v1061_v47 = vpop.f32.mrf.mxu0 }
 0x17b   :  { %v1089_v42 = vadd.f32 %v1088_v37, %v1060_v40  ;;  %v1062_v21 = vadd.f32 %v1926_v55, %v1061_v47 }
 0x182   :  { %v1090_v51 = vpop.f32.mrf.mxu1 }
 0x188   :  { %v1102_v56 = vpop.f32.mrf.mxu2 }
 0x189   :  { %v1103_v60 = vadd.f32 %v1102_v56, %v1074_v58  ;;  %v1091_v56 = vadd.f32 %v1090_v51, %v1062_v21 }
 0x190   :  { %v1131_v61 = vpop.f32.mrf.mxu3  ;;  %v1104_v63 = vpop.f32.mrf.mxu2 }
 0x191   :  { %v1132_v62 = vadd.f32 %v1131_v61, %v1103_v60  ;;  %v1105_v3 = vadd.f32 %v1104_v63, %v1076_v2 }
 0x193   :  { %v1151_v1 = vmax.f32 %v1132_v62, 0.0 }
 0x195   :  { %1159 = vst [vmem:[#allocation10] sm:$0xff] %v1151_v1 }
 0x198   :  { %v1133_v5 = vpop.f32.mrf.mxu3  ;;  %v1107_v7 = vpop.f32.mrf.mxu2 }
 0x199   :  { %v1134_v6 = vadd.f32 %v1133_v5, %v1105_v3  ;;  %v1108_v12 = vadd.f32 %v1107_v7, %v1079_v11 }
 0x19b   :  { %v1152_v10 = vmax.f32 %v1134_v6, 0.0 }
 0x19d   :  { %1160 = vst [vmem:[#allocation10 + $0x8] sm:$0xff] %v1152_v10 }
 0x1a0   :  { %v1136_v13 = vpop.f32.mrf.mxu3  ;;  %v1109_v15 = vpop.f32.mrf.mxu2 }
 0x1a1   :  { %v1137_v14 = vadd.f32 %v1136_v13, %v1108_v12  ;;  %v1110_v22 = vadd.f32 %v1109_v15, %v1081_v20 }
 0x1a3   :  { %v1153_v18 = vmax.f32 %v1137_v14, 0.0 }
 0x1a5   :  { %1161 = vst [vmem:[#allocation10 + $0x10] sm:$0xff] %v1153_v18 }
 0x1a8   :  { %v1138_v23 = vpop.f32.mrf.mxu3  ;;  %v1112_v24 = vpop.f32.mrf.mxu2 }
 0x1a9   :  { %v1139_v46 = vadd.f32 %v1138_v23, %v1110_v22  ;;  %v1113_v30 = vadd.f32 %v1112_v24, %v1084_v29 }
 0x1ab   :  { %v1154_v26 = vmax.f32 %v1139_v46, 0.0 }
 0x1ad   :  { %1162 = vst [vmem:[#allocation10 + $0x18] sm:$0xff] %v1154_v26 }
 0x1b0   :  { %v1141_v44 = vpop.f32.mrf.mxu3  ;;  %v1114_v31 = vpop.f32.mrf.mxu2 }
 0x1b1   :  { %v1142_v49 = vadd.f32 %v1141_v44, %v1113_v30  ;;  %v1115_v36 = vadd.f32 %v1114_v31, %v1086_v34 }
 0x1b3   :  { %v1155_v33 = vmax.f32 %v1142_v49, 0.0 }
 0x1b5   :  { %1163 = vst [vmem:[#allocation10 + $0x20] sm:$0xff] %v1155_v33 }
 0x1b8   :  { %v1143_v38 = vpop.f32.mrf.mxu3  ;;  %v1117_v43 = vpop.f32.mrf.mxu2 }
 0x1b9   :  { %v1144_v39 = vadd.f32 %v1143_v38, %v1115_v36  ;;  %v1118_v45 = vadd.f32 %v1117_v43, %v1089_v42 }
 0x1bb   :  { %v1156_v41 = vmax.f32 %v1144_v39, 0.0 }
 0x1bd   :  { %1164 = vst [vmem:[#allocation10 + $0x28] sm:$0xff] %v1156_v41 }
 0x1c0   :  { %v1146_v48 = vpop.f32.mrf.mxu3  ;;  %v1119_v54 = vpop.f32.mrf.mxu2 }
 0x1c1   :  { %v1147_v50 = vadd.f32 %v1146_v48, %v1118_v45  ;;  %v1120_v57 = vadd.f32 %v1119_v54, %v1091_v56 }
 0x1c3   :  { %v1157_v52 = vmax.f32 %v1147_v50, 0.0 }
 0x1c5   :  { %1165 = vst [vmem:[#allocation10 + $0x30] sm:$0xff] %v1157_v52 }
 0x1c8   :  { %v1148_v58 = vpop.f32.mrf.mxu3 }
 0x1c9   :  { %v1149_v59 = vadd.f32 %v1148_v58, %v1120_v57 }
 0x1cb   :  { %v1158_v60 = vmax.f32 %v1149_v59, 0.0 }
 0x1cd   :  { %1166 = vst [vmem:[#allocation10 + $0x38] sm:$0xff] %v1158_v60 }
 0x1ce   :  { %1179 = dma.vmem_to_hbm [thread:$0]  %s1172_s3, 1024, %s1174_s13, [#allocation4], %s1817_s14, %s1817_s14, %s1818_s15  }
 0x1cf   :  { %1806 = dma.done.wait [#allocation4], 1024  }
 0x1d0   :  { %1807 = vsyncadd [#allocation4], 4294966272 }
 0x1d1   :  { %1184 = vsyncpa [#allocation3], 1 }
 0x1d2   :  { %1185 = vsyncpa [#allocation6], 1 }
 0x1d3   :  { %1186 = vsyncpa [#allocation9], 1 }
 0x1d4   :  { %1187 = vsyncpa [#allocation4], 1 }

</bundles_post_ra>
